<compile_context>
chip_gen: v5e
topology: v5e:2x2
jax: 0.10.0
libtpu: 0.0.40
codegen_flags: <defaults>
</compile_context>

<pallas_src>
import functools

import jax
import jax.numpy as jnp
from jax.experimental import pallas as pl
from jax.experimental.pallas import tpu as pltpu


def _round_up(x: int, m: int) -> int:
    return ((x + m - 1) // m) * m


def _mlp_kernel(x_ref, w1_ref, b1_ref, w2_ref, b2_ref, w3t_ref, b3t_ref, o_ref,
                *, out_size: int):
    # x tile streamed in f32; cast to bf16 in-kernel (no extra wrapper-side HBM pass).
    x = x_ref[...].astype(jnp.bfloat16)                                      # (tile_b, in)

    # fc1 + ReLU  (bf16 MXU operands, f32 accumulation & elementwise)
    h1 = jnp.dot(x, w1_ref[...], preferred_element_type=jnp.float32) + b1_ref[...]
    h1 = jnp.maximum(h1, 0.0)                                                # (tile_b, h1)

    # fc2 + ReLU
    h2 = jnp.dot(h1.astype(jnp.bfloat16), w2_ref[...],
                 preferred_element_type=jnp.float32) + b2_ref[...]
    h2 = jnp.maximum(h2, 0.0)                                                # (tile_b, h2)

    # fc3 computed batch-major: (out_pad8, h2) x (tile_b, h2)^T -> (out_pad8, tile_b),
    # so the batch dimension is the 128-lane axis of the store (lane-dense writeback).
    logits = jax.lax.dot_general(
        w3t_ref[...], h2.astype(jnp.bfloat16),
        dimension_numbers=(((1,), (1,)), ((), ())),
        preferred_element_type=jnp.float32)                                  # (out_pad8, tile_b)

    # Bias + sigmoid only on the valid rows (EUP work = out_size * tile_b, not padded).
    logits = logits[:out_size, :] + b3t_ref[...]                             # (out_size, tile_b)
    o_ref[...] = jax.nn.sigmoid(logits).astype(o_ref.dtype)


def _choose_tile_b(B: int, tile_b_max: int) -> int:
    tile_b_max = max(128, _round_up(tile_b_max, 128))
    if B <= 256:
        return B  # single tile; block dims == full array dims (no (8,128) divisibility needed)
    # >= 2 grid steps so the "parallel" batch axis can shard across TensorCores (v7x megacore);
    # multiples of 128 keep the batch-major output store lane-dense even on ragged batches.
    return min(tile_b_max, _round_up(pl.cdiv(B, 2), 128))


def simple_nn_forward(x, params, *, tile_b_max=4096):
    """x: (B, input_size) float32. params: dict of w1,b1,w2,b2,w3,b3 (W stored as (in, out))."""
    w1, b1 = params["w1"], params["b1"]
    w2, b2 = params["w2"], params["b2"]
    w3, b3 = params["w3"], params["b3"]

    if x.dtype != jnp.float32:
        x = x.astype(jnp.float32)

    B, in_size = x.shape
    h1_size = w1.shape[1]
    h2_size = w2.shape[1]
    out_size = w3.shape[1]
    out_pad8 = _round_up(out_size, 8)  # sublane-aligned lhs for the fc3 matmul (padded rows = 0)

    # fc3 weight in transposed (batch-major) form, zero-padded to 8 sublanes.
    w3t = jnp.zeros((out_pad8, h2_size), jnp.float32).at[:out_size, :].set(w3.T)

    # Tiny one-off weight casts stay in the wrapper; biases stay f32; x stays f32 (cast in-kernel).
    w1_bf = w1.astype(jnp.bfloat16)
    w2_bf = w2.astype(jnp.bfloat16)
    w3t_bf = w3t.astype(jnp.bfloat16)
    b1_f = b1.astype(jnp.float32).reshape(1, h1_size)
    b2_f = b2.astype(jnp.float32).reshape(1, h2_size)
    b3t_f = b3.astype(jnp.float32).reshape(out_size, 1)

    tile_b = _choose_tile_b(B, tile_b_max)
    grid = (pl.cdiv(B, tile_b),)

    # Weights/biases: same block every grid step -> stay VMEM-resident across the batch loop.
    resident = lambda arr: pl.BlockSpec(arr.shape, lambda i: (0, 0))

    flops = 2 * B * (in_size * h1_size + h1_size * h2_size + h2_size * out_pad8)
    bytes_accessed = (
        x.size * 4                                           # f32 activations in
        + (w1_bf.size + w2_bf.size + w3t_bf.size) * 2        # bf16 weights
        + (b1_f.size + b2_f.size + b3t_f.size) * 4           # f32 biases
        + B * out_size * 4                                   # batch-major f32 output
    )

    out_t = pl.pallas_call(
        functools.partial(_mlp_kernel, out_size=out_size),
        out_shape=jax.ShapeDtypeStruct((out_size, B), jnp.float32),
        grid=grid,
        in_specs=[
            pl.BlockSpec((tile_b, in_size), lambda i: (i, 0)),   # streamed batch tile (f32)
            resident(w1_bf), resident(b1_f),
            resident(w2_bf), resident(b2_f),
            resident(w3t_bf), resident(b3t_f),
        ],
        out_specs=pl.BlockSpec((out_size, tile_b), lambda i: (0, i)),
        compiler_params=pltpu.CompilerParams(
            dimension_semantics=("parallel",),   # batch grid shards across TCs (v7x megacore)
        ),
        cost_estimate=pl.CostEstimate(
            flops=flops,
            transcendentals=B * out_size,
            bytes_accessed=bytes_accessed,
        ),
    )(x, w1_bf, b1_f, w2_bf, b2_f, w3t_bf, b3t_f)

    # (out_size, B) -> (B, out_size); for out_size == 1 this is a free reshape (no transpose).
    if out_size == 1:
        return out_t.reshape(B, 1)
    return out_t.T


def init_params(key, input_size, hidden_size1, hidden_size2, output_size):
    """Deterministic init mimicking nn.Linear's uniform(-1/sqrt(fan_in), 1/sqrt(fan_in))."""
    ks = jax.random.split(key, 6)

    def linear(kw, kb, fan_in, fan_out):
        bound = 1.0 / jnp.sqrt(fan_in)
        # stored as (in, out) so forward is x @ W + b (matches nn.Linear's x @ W.T + b)
        w = jax.random.uniform(kw, (fan_in, fan_out), jnp.float32, -bound, bound)
        b = jax.random.uniform(kb, (1, fan_out), jnp.float32, -bound, bound)
        return w, b

    w1, b1 = linear(ks[0], ks[1], input_size, hidden_size1)
    w2, b2 = linear(ks[2], ks[3], hidden_size1, hidden_size2)
    w3, b3 = linear(ks[4], ks[5], hidden_size2, output_size)
    return {"w1": w1, "b1": b1, "w2": w2, "b2": b2, "w3": w3, "b3": b3}


def reference_forward_f32(x, p):
    """Pure f32 reference (PyTorch semantics)."""
    h1 = jnp.maximum(x @ p["w1"] + p["b1"], 0.0)
    h2 = jnp.maximum(h1 @ p["w2"] + p["b2"], 0.0)
    return jax.nn.sigmoid(h2 @ p["w3"] + p["b3"])


def reference_forward_bf16(x, p):
    """Reference mirroring the kernel's precision: bf16 matmul inputs, f32 accumulation."""
    xb = x.astype(jnp.bfloat16)
    w1b = p["w1"].astype(jnp.bfloat16)
    w2b = p["w2"].astype(jnp.bfloat16)
    w3b = p["w3"].astype(jnp.bfloat16)
    h1 = jnp.maximum(jnp.dot(xb, w1b, preferred_element_type=jnp.float32) + p["b1"], 0.0)
    h2 = jnp.maximum(
        jnp.dot(h1.astype(jnp.bfloat16), w2b, preferred_element_type=jnp.float32) + p["b2"], 0.0)
    logits = jnp.dot(h2.astype(jnp.bfloat16), w3b, preferred_element_type=jnp.float32) + p["b3"]
    return jax.nn.sigmoid(logits)


if __name__ == "__main__":
    key = jax.random.PRNGKey(0)
    k_x, k_p, k_x2 = jax.random.split(key, 3)

    batch = 8
    input_size = 32
    hidden_size1 = 64
    hidden_size2 = 32
    output_size = 1  # binary classification head (Sigmoid output)

    x = jax.random.normal(k_x, (batch, input_size), dtype=jnp.float32)
    params = init_params(k_p, input_size, hidden_size1, hidden_size2, output_size)

    # --- small demo batch (single tile, grid=(1,)) ---
    out = simple_nn_forward(x, params)
    out = jax.block_until_ready(out)
    assert out.shape == (batch, output_size)

    ref_bf16 = reference_forward_bf16(x, params)
    assert jnp.allclose(out, ref_bf16, atol=1e-4, rtol=1e-4), "mismatch vs bf16-mirrored reference"
    ref_f32 = reference_forward_f32(x, params)
    assert jnp.allclose(out, ref_f32, atol=2e-2, rtol=2e-2), "mismatch vs f32 reference"

    # --- larger ragged batch (multi-tile grid with a partial last tile) ---
    batch2 = 300
    x2 = jax.random.normal(k_x2, (batch2, input_size), dtype=jnp.float32)
    out2 = jax.block_until_ready(simple_nn_forward(x2, params))
    assert out2.shape == (batch2, output_size)
    ref2 = reference_forward_bf16(x2, params)
    assert jnp.allclose(out2, ref2, atol=1e-4, rtol=1e-4), "mismatch vs bf16 ref (ragged batch)"

    print("KERNEL_OK")
</pallas_src>

<mosaic_0001>
module attributes {stable_mosaic.version = 11 : i64} {
  func.func @_mlp_kernel(%arg0: i32, %arg1: memref<8x32xf32, #tpu.memory_space<vmem>>, %arg2: memref<32x64xbf16, #tpu.memory_space<vmem>>, %arg3: memref<1x64xf32, #tpu.memory_space<vmem>>, %arg4: memref<64x32xbf16, #tpu.memory_space<vmem>>, %arg5: memref<1x32xf32, #tpu.memory_space<vmem>>, %arg6: memref<8x32xbf16, #tpu.memory_space<vmem>>, %arg7: memref<1x1xf32, #tpu.memory_space<vmem>>, %arg8: memref<1x8xf32, #tpu.memory_space<vmem>>) attributes {dimension_semantics = [#tpu.dimension_semantics<parallel>], iteration_bounds = array<i64: 1>, scalar_prefetch = 0 : i64, scratch_operands = 0 : i64, tpu.core_type = #tpu.core_type<tc>, window_params = [{transform_indices = @transform_0, window_bounds = array<i64: 8, 32>}, {pipeline_mode = #tpu.pipeline_mode<synchronous>, transform_indices = @transform_1, window_bounds = array<i64: 32, 64>}, {pipeline_mode = #tpu.pipeline_mode<synchronous>, transform_indices = @transform_2, window_bounds = array<i64: 1, 64>}, {pipeline_mode = #tpu.pipeline_mode<synchronous>, transform_indices = @transform_3, window_bounds = array<i64: 64, 32>}, {pipeline_mode = #tpu.pipeline_mode<synchronous>, transform_indices = @transform_4, window_bounds = array<i64: 1, 32>}, {pipeline_mode = #tpu.pipeline_mode<synchronous>, transform_indices = @transform_5, window_bounds = array<i64: 8, 32>}, {pipeline_mode = #tpu.pipeline_mode<synchronous>, transform_indices = @transform_6, window_bounds = array<i64: 1, 1>}, {transform_indices = @transform_7, window_bounds = array<i64: 1, 8>}]} {
    %c0 = arith.constant 0 : index
    %c0_0 = arith.constant 0 : index
    %0 = vector.load %arg1[%c0, %c0_0] : memref<8x32xf32, #tpu.memory_space<vmem>>, vector<8x32xf32>
    %1 = arith.truncf %0 : vector<8x32xf32> to vector<8x32xbf16>
    %c0_1 = arith.constant 0 : index
    %c0_2 = arith.constant 0 : index
    %2 = vector.load %arg2[%c0_1, %c0_2] : memref<32x64xbf16, #tpu.memory_space<vmem>>, vector<32x64xbf16>
    %cst = arith.constant dense<0.000000e+00> : vector<8x64xf32>
    %3 = tpu.matmul %1, %2, %cst {dimension_numbers = #tpu.dot_dimension_numbers<[1], [0], [0], [1], [0, 0, 1, 1], [], []>} : vector<8x32xbf16>, vector<32x64xbf16>, vector<8x64xf32> -> vector<8x64xf32>
    %c0_3 = arith.constant 0 : index
    %c0_4 = arith.constant 0 : index
    %4 = vector.load %arg3[%c0_3, %c0_4] : memref<1x64xf32, #tpu.memory_space<vmem>>, vector<1x64xf32>
    %5 = vector.broadcast %4 : vector<1x64xf32> to vector<8x64xf32>
    %6 = arith.addf %3, %5 : vector<8x64xf32>
    %cst_5 = arith.constant 0.000000e+00 : f32
    %7 = vector.broadcast %cst_5 : f32 to vector<8x64xf32>
    %8 = arith.maximumf %6, %7 : vector<8x64xf32>
    %9 = arith.truncf %8 : vector<8x64xf32> to vector<8x64xbf16>
    %c0_6 = arith.constant 0 : index
    %c0_7 = arith.constant 0 : index
    %10 = vector.load %arg4[%c0_6, %c0_7] : memref<64x32xbf16, #tpu.memory_space<vmem>>, vector<64x32xbf16>
    %cst_8 = arith.constant dense<0.000000e+00> : vector<8x32xf32>
    %11 = tpu.matmul %9, %10, %cst_8 {dimension_numbers = #tpu.dot_dimension_numbers<[1], [0], [0], [1], [0, 0, 1, 1], [], []>} : vector<8x64xbf16>, vector<64x32xbf16>, vector<8x32xf32> -> vector<8x32xf32>
    %c0_9 = arith.constant 0 : index
    %c0_10 = arith.constant 0 : index
    %12 = vector.load %arg5[%c0_9, %c0_10] : memref<1x32xf32, #tpu.memory_space<vmem>>, vector<1x32xf32>
    %13 = vector.broadcast %12 : vector<1x32xf32> to vector<8x32xf32>
    %14 = arith.addf %11, %13 : vector<8x32xf32>
    %cst_11 = arith.constant 0.000000e+00 : f32
    %15 = vector.broadcast %cst_11 : f32 to vector<8x32xf32>
    %16 = arith.maximumf %14, %15 : vector<8x32xf32>
    %c0_12 = arith.constant 0 : index
    %c0_13 = arith.constant 0 : index
    %17 = vector.load %arg6[%c0_12, %c0_13] : memref<8x32xbf16, #tpu.memory_space<vmem>>, vector<8x32xbf16>
    %18 = arith.truncf %16 : vector<8x32xf32> to vector<8x32xbf16>
    %cst_14 = arith.constant dense<0.000000e+00> : vector<8x8xf32>
    %19 = tpu.matmul %17, %18, %cst_14 {dimension_numbers = #tpu.dot_dimension_numbers<[1], [1], [0], [0], [0, 0, 1, 0], [], []>} : vector<8x32xbf16>, vector<8x32xbf16>, vector<8x8xf32> -> vector<8x8xf32>
    %20 = vector.extract_strided_slice %19 {offsets = [0, 0], sizes = [1, 8], strides = [1, 1]} : vector<8x8xf32> to vector<1x8xf32>
    %c0_15 = arith.constant 0 : index
    %c0_16 = arith.constant 0 : index
    %21 = vector.load %arg7[%c0_15, %c0_16] : memref<1x1xf32, #tpu.memory_space<vmem>>, vector<1x1xf32>
    %22 = vector.broadcast %21 : vector<1x1xf32> to vector<1x8xf32>
    %23 = arith.addf %20, %22 : vector<1x8xf32>
    %24 = arith.negf %23 : vector<1x8xf32>
    %25 = math.exp %24 : vector<1x8xf32>
    %cst_17 = arith.constant 1.000000e+00 : f32
    %26 = vector.broadcast %cst_17 : f32 to vector<1x8xf32>
    %27 = arith.addf %26, %25 : vector<1x8xf32>
    %28 = arith.divf %26, %27 : vector<1x8xf32>
    %c0_18 = arith.constant 0 : index
    %c0_19 = arith.constant 0 : index
    %29 = vector.load %arg8[%c0_18, %c0_19] : memref<1x8xf32, #tpu.memory_space<vmem>>, vector<1x8xf32>
    tpu.vector_store %arg8[%c0_18, %c0_19], %28 {strides = array<i32>} : memref<1x8xf32, #tpu.memory_space<vmem>>, vector<1x8xf32>,
    return
  }
  func.func @transform_0(%arg0: i32) -> (i32, i32) {
    %c0_i32 = arith.constant 0 : i32
    %c0_i32_0 = arith.constant 0 : i32
    return %arg0, %c0_i32 : i32, i32
  }
  func.func @transform_1(%arg0: i32) -> (i32, i32) {
    %c0_i32 = arith.constant 0 : i32
    %c0_i32_0 = arith.constant 0 : i32
    %c0_i32_1 = arith.constant 0 : i32
    return %c0_i32, %c0_i32_0 : i32, i32
  }
  func.func @transform_2(%arg0: i32) -> (i32, i32) {
    %c0_i32 = arith.constant 0 : i32
    %c0_i32_0 = arith.constant 0 : i32
    %c0_i32_1 = arith.constant 0 : i32
    return %c0_i32, %c0_i32_0 : i32, i32
  }
  func.func @transform_3(%arg0: i32) -> (i32, i32) {
    %c0_i32 = arith.constant 0 : i32
    %c0_i32_0 = arith.constant 0 : i32
    %c0_i32_1 = arith.constant 0 : i32
    return %c0_i32, %c0_i32_0 : i32, i32
  }
  func.func @transform_4(%arg0: i32) -> (i32, i32) {
    %c0_i32 = arith.constant 0 : i32
    %c0_i32_0 = arith.constant 0 : i32
    %c0_i32_1 = arith.constant 0 : i32
    return %c0_i32, %c0_i32_0 : i32, i32
  }
  func.func @transform_5(%arg0: i32) -> (i32, i32) {
    %c0_i32 = arith.constant 0 : i32
    %c0_i32_0 = arith.constant 0 : i32
    %c0_i32_1 = arith.constant 0 : i32
    return %c0_i32, %c0_i32_0 : i32, i32
  }
  func.func @transform_6(%arg0: i32) -> (i32, i32) {
    %c0_i32 = arith.constant 0 : i32
    %c0_i32_0 = arith.constant 0 : i32
    %c0_i32_1 = arith.constant 0 : i32
    return %c0_i32, %c0_i32_0 : i32, i32
  }
  func.func @transform_7(%arg0: i32) -> (i32, i32) {
    %c0_i32 = arith.constant 0 : i32
    %c0_i32_0 = arith.constant 0 : i32
    return %c0_i32, %arg0 : i32, i32
  }
}

</mosaic_0001>

<bundles_post_ra>
// kernel: tpu_custom_call.1
= control target key start
LH: loop header
LB: loop body
LE: loop exit
PB: predicated region body
PF: predicated region fallthrough
CT: control target
= control target key end

     0   :  { %s341_s0 = inlined_call_operand.vmem [shape: f32[8,32], index: 0, kind: input, shape index: {}]   ;;  %s342_s1 = inlined_call_operand.vmem [shape: bf16[32,64], index: 1, kind: input, shape index: {}]   ;;  %s343_s2 = inlined_call_operand.vmem [shape: f32[1,64], index: 2, kind: input, shape index: {}]   ;;  %s344_s3 = inlined_call_operand.vmem [shape: bf16[64,32], index: 3, kind: input, shape index: {}]   ;;  %s345_s4 = inlined_call_operand.vmem [shape: f32[1,32], index: 4, kind: input, shape index: {}]   ;;  %s346_s5 = inlined_call_operand.vmem [shape: bf16[8,32], index: 5, kind: input, shape index: {}]   ;;  %s347_s6 = inlined_call_operand.<no memory space> [shape: f32[1,1], index: 6, kind: input, shape index: {}]   ;;  %s348_s7 = inlined_call_operand.hbm [shape: f32[1,8], index: 7, kind: output, shape index: {}]  }
   0x1   :  { %v12_v0 = vstv %s347_s6 }
   0x2   :  { %13 = vst [vmem:[#allocation2] sm:$0x1] %v12_v0 }
   0x3   :  { %v220_v1 = vld [vmem:[%s342_s1 + $0x8] sm:$0xff]  ;;  %v219_v2 = vld [vmem:[%s342_s1] sm:$0xff]  ;;  %v224_v3 = vld [vmem:[%s344_s3 + $0x18] sm:$0xff] }
   0x4   :  { %62 = vmatpush.bf16.msra.mxu0 %v220_v1  ;;  %v30_v4 = vld [vmem:[%s341_s0] sm:$0xff] }
   0x5   :  { %14 = vsyncpa [#allocation4], 0  ;;  %115 = vmatpush.bf16.msra.mxu1 %v224_v3  ;;  %v223_v5 = vld [vmem:[%s344_s3 + $0x10] sm:$0xff]  ;;  %v31_v6 = vpack.c.bf16 %v30_v4, %v30_v4  ;;  %vm52_vm0 = vcmask 261120   ;;  %v222_v7 = vld [vmem:[%s344_s3 + $0x8] sm:$0xff]  ;;  %vm107_vm1 = vcmask 523264  }
   0x6   :  { %v221_v8 = vld [vmem:[%s344_s3] sm:$0xff]  ;;  %v260_v16 = vmov 0   ;;  %s182_s20 = sshll.u32 %s348_s7, 4  ;;  %vm173_vm5 = vcmask 57344   ;;  %s183_s20 = int_to_ptr.hbm [resolvable:$true] %s182_s20 }
   0x7   :  { %v228_v9 = vld [vmem:[%s343_s2] ss:$0 sm:$0xff]  ;;  %227 = vset.pattern.permute.xlu0 %v260_v16 }
   0x8   :  { %63 = vmatpush.bf16.msra.mxu0 %v219_v2  ;;  %v229_v17 = vld [vmem:[%s345_s4] ss:$0 sm:$0xff]  ;;  %s261_s4 = smov [#allocation3]  }
   0x9   :  { %116 = vmatpush.bf16.msra.mxu1 %v223_v5  ;;  %v146_v15 = vld [vmem:[#allocation2] sm:$0x1] }
   0xa   :  { %149 = vperm.xlu0 %227, %v146_v15   ;;  %v125_v24 = vld [vmem:[%s346_s5] sm:$0xf]  ;;  %s180_s5 = sshll.u32 %s261_s4, 4  ;;  %s181_s5 = int_to_ptr.vmem [resolvable:$true] %s180_s5 }
   0xb   :  { %199 = vmatmul.msk.bf16.vlgmr.msra.gmra.mxu0 %vm52_vm0, %v31_v6 }
   0xd   :  { %117 = vmatpush.bf16.msra.mxu1 %v222_v7 }
  0x11   :  { %118 = vmatpush.bf16.msra.mxu1 %v221_v8 }
  0x7c   :  { %v150_v25 = vpop.permute.xlu0 %149 }
  0x7d   :  { %v152_v26 = vperm.slane %v150_v25, 0 }
  0x88   :  { %v65_v10 = vpop.f32.mrf.mxu0 }
  0x89   :  { %v66_v11 = vadd.f32 %v228_v9, %v65_v10 }
  0x8b   :  { %v69_v12 = vmax.f32 %v66_v11, 0.0 }
  0x8d   :  { %v70_v13 = vpack.c.bf16 %v69_v12, %v69_v12 }
  0x8f   :  { %216 = vmatmul.msk.bf16.vlgmr.msra.gmra.mxu1 %vm107_vm1, %v70_v13 }
  0x90   :  { %v67_v14 = vpop.f32.mrf.mxu0 }
 0x10c   :  { %v120_v18 = vpop.f32.mrf.mxu1 }
 0x10d   :  { %v121_v19 = vadd.f32 %v229_v17, %v120_v18 }
 0x10f   :  { %v124_v20 = vmax.f32 %v121_v19, 0.0 }
 0x111   :  { %v126_v21 = vpack.c.bf16 %v124_v20, %v124_v20 }
 0x113   :  { %v131_v22 = vsel %vm52_vm0, %v126_v21, 0 }
 0x114   :  { %v122_v23 = vpop.f32.mrf.mxu1  ;;  %140 = vmatpush.bf16.xpose.msra.mxu2 %v131_v22 }
 0x11b   :  { %217 = vmatmul.msk.bf16.vlgmr.msra.gmra.mxu2 %vm52_vm0, %v125_v24 }
 0x19e   :  { %v142_v27 = vpop.f32.mrf.mxu2 }
 0x19f   :  { %v153_v28 = vadd.f32 %v152_v26, %v142_v27 }
 0x1a1   :  { %v218_v29 = vmul.f32 -1.442695, %v153_v28 }
 0x1a3   :  { %230 = vpow2.f32 %v218_v29 }
 0x1a6   :  { %v144_v30 = vpop.f32.mrf.mxu2 }
 0x1a9   :  { %v231_v31 = vpop.eup %230 }
 0x1aa   :  { %v157_v32 = vadd.f32 1.0, %v231_v31 }
 0x1ac   :  { %232 = vrcp.f32 %v157_v32  ;;  %v169_v36 = vand.u32 2147483648, %v157_v32  ;;  %v167_v38 = vand.u32 2147483647, %v157_v32  ;;  %vm163_vm3 = vweird.f32 %v157_v32 }
 0x1ae   :  { %v170_v40 = vor.u32 1.1754944e-38, %v169_v36  ;;  %vm168_vm6 = vcmp.eq.f32.partialorder %v167_v38, 8.507059e+37 }
 0x1b2   :  { %v233_v33 = vpop.eup %232 }
 0x1b3   :  { %v159_v34 = vmul.f32 %v233_v33, %v157_v32  ;;  %vm164_vm2 = vweird.f32 %v233_v33 }
 0x1b4   :  { %vm165_vm4 = vmor %vm163_vm3, %vm164_vm2 }
 0x1b5   :  { %v160_v35 = vsub.f32 1.0, %v159_v34 }
 0x1b7   :  { %v161_v37 = vmul.f32 %v233_v33, %v160_v35 }
 0x1b9   :  { %v162_v39 = vadd.f32 %v233_v33, %v161_v37 }
 0x1bb   :  { %v166_v41 = vsel %vm165_vm4, %v233_v33, %v162_v39 }
 0x1bc   :  { %v171_v42 = vsel %vm168_vm6, %v170_v40, %v166_v41 }
 0x1bd   :  { %174 = vst.msk [vmem:[#allocation3] sm:$0x1] %vm173_vm5, %v171_v42 }
 0x1be   :  { %185 = dma.vmem_to_hbm [thread:$0]  %s181_s5, 16, %s183_s20, [#allocation4]  }
 0x1bf   :  { %258 = dma.done.wait [#allocation4], 16  }
 0x1c0   :  { %259 = vsyncadd [#allocation4], 4294967280 }
 0x1c1   :  { %190 = vsyncpa [#allocation4], 1 }

</bundles_post_ra>
